<compile_context>
chip_gen: v6e
topology: v6e:2x2x1
jax: 0.10.0
libtpu: 0.0.40
codegen_flags: <defaults>
</compile_context>

<pallas_src>
import functools

import jax
import jax.numpy as jnp
from jax.experimental import pallas as pl
from jax.experimental.pallas import tpu as pltpu

_LANES = 128
_SUBLANES = 8
_TILE_R = 4096                           # 2 MiB f32 per tensor per grid step
_FAST_MAX_ALIGNED = _TILE_R * _LANES     # one tile's worth -> single-block path
_FAST_MAX_UNALIGNED = 64 * 1024          # (1, n) layout wastes sublanes; keep small
_NEUTRAL = 1e4                           # softplus(-1e4) == 0.0 exactly in f32
_VMEM_LIMIT = 40 * 1024 * 1024           # 2 in x 2 bufs x 2 MiB + temps, w/ headroom (<64 MiB v7x)


def _cdiv(a, b):
    return (a + b - 1) // b


def _softplus(x):
    # Numerically stable softplus: max(x, 0) + log(1 + exp(-|x|)).
    return jnp.maximum(x, 0.0) + jnp.log(1.0 + jnp.exp(-jnp.abs(x)))


def _sublane_granularity(dtype):
    # f32 -> 8, bf16/f16 -> 16, int8/fp8 -> 32.
    return _SUBLANES * max(1, 4 // jnp.dtype(dtype).itemsize)


# ---------------------------------------------------------------------------
# Fast path: both lane-dense slabs fit comfortably in VMEM -> single block,
# no grid, scalar sums straight to SMEM (no accumulator writeback at all).
# ---------------------------------------------------------------------------
def _small_kernel(r_ref, f_ref, o_ref):
    r = r_ref[...].astype(jnp.float32)
    f = f_ref[...].astype(jnp.float32)
    o_ref[0] = jnp.sum(_softplus(-r))
    o_ref[1] = jnp.sum(_softplus(f))


def _small_sums(real2d, fake2d):
    out = pl.pallas_call(
        _small_kernel,
        out_shape=jax.ShapeDtypeStruct((2,), jnp.float32),
        in_specs=[
            pl.BlockSpec(memory_space=pltpu.MemorySpace.VMEM),
            pl.BlockSpec(memory_space=pltpu.MemorySpace.VMEM),
        ],
        out_specs=pl.BlockSpec(memory_space=pltpu.MemorySpace.SMEM),
    )(real2d, fake2d)
    return out[0], out[1]


# ---------------------------------------------------------------------------
# Tiled path: big inputs, fused real+fake streaming over one reduction axis.
# ---------------------------------------------------------------------------
def _tiled_kernel(r_ref, f_ref, o_ref, *, tile_r, valid_rows, needs_mask):
    i = pl.program_id(0)

    @pl.when(i == 0)
    def _init():
        o_ref[...] = jnp.zeros_like(o_ref)

    spr = _softplus(-r_ref[...].astype(jnp.float32))   # (tile_r, 128)
    spf = _softplus(f_ref[...].astype(jnp.float32))

    def _accumulate(a, b):
        # (tile_r, 128) -> (tile_r//8, 8, 128) -> (8, 128): pure VPU vreg adds.
        o_ref[0, :, :] += a.reshape(tile_r // _SUBLANES, _SUBLANES, _LANES).sum(axis=0)
        o_ref[1, :, :] += b.reshape(tile_r // _SUBLANES, _SUBLANES, _LANES).sum(axis=0)

    if needs_mask:
        row0 = i * tile_r
        is_full = row0 + tile_r <= valid_rows

        @pl.when(is_full)
        def _():  # interior tiles: no mask math at all
            _accumulate(spr, spf)

        @pl.when(jnp.logical_not(is_full))
        def _():  # final partial tile: zero out DMA-garbage rows
            rows = jax.lax.broadcasted_iota(jnp.int32, spr.shape, 0) + row0
            keep = rows < valid_rows
            _accumulate(jnp.where(keep, spr, 0.0), jnp.where(keep, spf, 0.0))
    else:
        _accumulate(spr, spf)


def _tiled_sums(real2d, fake2d, tile_r):
    rows = real2d.shape[0]
    g = max(_sublane_granularity(real2d.dtype), _sublane_granularity(fake2d.dtype))
    tile_r = min(tile_r, rows)
    tile_r = max(g, (tile_r // g) * g)
    num_tiles = _cdiv(rows, tile_r)
    needs_mask = (rows % tile_r) != 0

    kernel = functools.partial(
        _tiled_kernel, tile_r=tile_r, valid_rows=rows, needs_mask=needs_mask)

    n_elems = int(real2d.size) + int(fake2d.size)
    cost = pl.CostEstimate(
        flops=8 * n_elems,
        transcendentals=2 * n_elems,  # exp + log per element
        bytes_accessed=int(real2d.size) * real2d.dtype.itemsize
        + int(fake2d.size) * fake2d.dtype.itemsize
        + 2 * _SUBLANES * _LANES * 4,
    )

    out = pl.pallas_call(
        kernel,
        out_shape=jax.ShapeDtypeStruct((2, _SUBLANES, _LANES), jnp.float32),
        grid=(num_tiles,),
        in_specs=[
            pl.BlockSpec((tile_r, _LANES), lambda i: (i, 0)),
            pl.BlockSpec((tile_r, _LANES), lambda i: (i, 0)),
        ],
        out_specs=pl.BlockSpec((2, _SUBLANES, _LANES), lambda i: (0, 0, 0)),
        compiler_params=pltpu.CompilerParams(
            dimension_semantics=("arbitrary",),
            vmem_limit_bytes=_VMEM_LIMIT,
        ),
        cost_estimate=cost,
    )(real2d, fake2d)
    return jnp.sum(out[0]), jnp.sum(out[1])


# ---------------------------------------------------------------------------
# Slab preparation / dispatch.
# ---------------------------------------------------------------------------
def _is_small(n):
    if n % _LANES == 0:
        return n <= _FAST_MAX_ALIGNED
    return n <= _FAST_MAX_UNALIGNED


def _small_slab(x):
    n = int(x.size)
    if n % _LANES == 0:
        return x.reshape(n // _LANES, _LANES)   # free reshape, lane-dense
    return x.reshape(1, n)                      # full-array block, no pad/copy


def _tiled_slab(x, neutral):
    flat = x.reshape(-1)
    rem = int(flat.size) % _LANES
    if rem:
        # Rare: huge tensor whose element count is not a multiple of 128.
        # Pad the tail with a softplus-neutral value (contributes exactly 0).
        # This is the only path that copies the input.
        flat = jnp.pad(flat, (0, _LANES - rem), constant_values=neutral)
    return flat.reshape(-1, _LANES)


def _single_term_sum(x, negate, tile_r):
    """sum(softplus(-x)) if negate else sum(softplus(x)).

    Rare fallback used only when real/fake element counts differ and at least
    one tensor is large (the fused kernels are reused, one term is discarded).
    """
    n = int(x.size)
    if _is_small(n):
        s_neg, s_pos = _small_sums(_small_slab(x), _small_slab(x))
    else:
        slab = _tiled_slab(x, _NEUTRAL if negate else -_NEUTRAL)
        s_neg, s_pos = _tiled_sums(slab, slab, tile_r)
    return s_neg if negate else s_pos


def vanilla_loss(logits_real, logits_fake, *, tile_r=_TILE_R):
    """0.5 * (mean(softplus(-logits_real)) + mean(softplus(logits_fake)))."""
    n_r = int(logits_real.size)
    n_f = int(logits_fake.size)

    if _is_small(n_r) and _is_small(n_f):
        s_r, s_f = _small_sums(_small_slab(logits_real), _small_slab(logits_fake))
    elif n_r == n_f:
        s_r, s_f = _tiled_sums(_tiled_slab(logits_real, _NEUTRAL),
                               _tiled_slab(logits_fake, -_NEUTRAL), tile_r)
    else:
        s_r = _single_term_sum(logits_real, True, tile_r)
        s_f = _single_term_sum(logits_fake, False, tile_r)

    return 0.5 * (s_r / jnp.float32(n_r) + s_f / jnp.float32(n_f))


def _reference(logits_real, logits_fake):
    lr = logits_real.astype(jnp.float32)
    lf = logits_fake.astype(jnp.float32)
    return 0.5 * (jnp.mean(jax.nn.softplus(-lr)) + jnp.mean(jax.nn.softplus(lf)))


if __name__ == "__main__":
    key = jax.random.PRNGKey(0)
    k1, k2, k3, k4, k5, k6 = jax.random.split(key, 6)

    # 1) Main check: small discriminator logit maps (fast path, lane-aligned).
    shape = (2, 1, 16, 16)
    logits_real = jax.random.normal(k1, shape, dtype=jnp.float32)
    logits_fake = jax.random.normal(k2, shape, dtype=jnp.float32)
    loss = jax.block_until_ready(vanilla_loss(logits_real, logits_fake))
    ref = jax.block_until_ready(_reference(logits_real, logits_fake))
    assert jnp.allclose(loss, ref, rtol=1e-5, atol=1e-6), (loss, ref)

    # 2) Unaligned small shape (fast path, (1, n) slab, no pad).
    r2 = jax.random.normal(k3, (2, 1, 15, 15), dtype=jnp.float32)
    f2 = jax.random.normal(k4, (2, 1, 15, 15), dtype=jnp.float32)
    loss2 = jax.block_until_ready(vanilla_loss(r2, f2))
    ref2 = jax.block_until_ready(_reference(r2, f2))
    assert jnp.allclose(loss2, ref2, rtol=1e-5, atol=1e-6), (loss2, ref2)

    # 3) Tiled-path smoke test at a small size (forced small tile): exercises
    #    multi-tile accumulation, the masked partial last tile and the
    #    softplus-neutral tail padding.
    r3 = jax.random.normal(k5, (3, 3, 30, 30), dtype=jnp.float32)   # 8100 elems
    f3 = jax.random.normal(k6, (3, 3, 30, 30), dtype=jnp.float32)
    s_r, s_f = _tiled_sums(_tiled_slab(r3, _NEUTRAL), _tiled_slab(f3, -_NEUTRAL), 48)
    loss3 = jax.block_until_ready(
        0.5 * (s_r / jnp.float32(r3.size) + s_f / jnp.float32(f3.size)))
    ref3 = jax.block_until_ready(_reference(r3, f3))
    assert jnp.allclose(loss3, ref3, rtol=1e-5, atol=1e-6), (loss3, ref3)

    # 4) Tiled path, exact division (unmasked specialization).
    r4 = jax.random.normal(k5, (4, 4, 32, 32), dtype=jnp.float32)   # 16384 elems
    f4 = jax.random.normal(k6, (4, 4, 32, 32), dtype=jnp.float32)
    s_r4, s_f4 = _tiled_sums(_tiled_slab(r4, _NEUTRAL), _tiled_slab(f4, -_NEUTRAL), 64)
    loss4 = jax.block_until_ready(
        0.5 * (s_r4 / jnp.float32(r4.size) + s_f4 / jnp.float32(f4.size)))
    ref4 = jax.block_until_ready(_reference(r4, f4))
    assert jnp.allclose(loss4, ref4, rtol=1e-5, atol=1e-6), (loss4, ref4)

    print("KERNEL_OK")
</pallas_src>

<mosaic_0001>
module attributes {stable_mosaic.version = 11 : i64} {
  func.func @_small_kernel(%arg0: memref<4x128xf32, #tpu.memory_space<vmem>>, %arg1: memref<4x128xf32, #tpu.memory_space<vmem>>, %arg2: memref<2xf32, #tpu.memory_space<smem>>) attributes {dimension_semantics = [], scalar_prefetch = 0 : i64, scratch_operands = 0 : i64, tpu.core_type = #tpu.core_type<tc>} {
    %c0 = arith.constant 0 : index
    %c0_0 = arith.constant 0 : index
    %0 = vector.load %arg0[%c0, %c0_0] : memref<4x128xf32, #tpu.memory_space<vmem>>, vector<4x128xf32>
    %c0_1 = arith.constant 0 : index
    %c0_2 = arith.constant 0 : index
    %1 = vector.load %arg1[%c0_1, %c0_2] : memref<4x128xf32, #tpu.memory_space<vmem>>, vector<4x128xf32>
    %cst = arith.constant 0.000000e+00 : f32
    %2 = vector.broadcast %cst : f32 to vector<4x128xf32>
    %3 = arith.subf %2, %0 : vector<4x128xf32>
    %cst_3 = arith.constant 0.000000e+00 : f32
    %4 = vector.broadcast %cst_3 : f32 to vector<4x128xf32>
    %5 = arith.maximumf %3, %4 : vector<4x128xf32>
    %6 = math.absf %3 : vector<4x128xf32>
    %cst_4 = arith.constant 0.000000e+00 : f32
    %7 = vector.broadcast %cst_4 : f32 to vector<4x128xf32>
    %8 = arith.subf %7, %6 : vector<4x128xf32>
    %9 = math.exp %8 : vector<4x128xf32>
    %cst_5 = arith.constant 1.000000e+00 : f32
    %10 = vector.broadcast %cst_5 : f32 to vector<4x128xf32>
    %11 = arith.addf %10, %9 : vector<4x128xf32>
    %12 = math.log %11 : vector<4x128xf32>
    %13 = arith.addf %5, %12 : vector<4x128xf32>
    %14 = vector.shape_cast %13 : vector<4x128xf32> to vector<1x4x128xf32>
    %cst_6 = arith.constant dense<0.000000e+00> : vector<1xf32>
    %15 = vector.multi_reduction <add>, %14, %cst_6 [1, 2] : vector<1x4x128xf32> to vector<1xf32>
    %16 = vector.shape_cast %15 : vector<1xf32> to vector<1x1x1xf32>
    %17 = vector.extract %16[0, 0, 0] : f32 from vector<1x1x1xf32>
    %c0_7 = arith.constant 0 : index
    %18 = memref.load %arg2[%c0_7] : memref<2xf32, #tpu.memory_space<smem>>
    memref.store %17, %arg2[%c0_7] : memref<2xf32, #tpu.memory_space<smem>>
    %cst_8 = arith.constant 0.000000e+00 : f32
    %19 = vector.broadcast %cst_8 : f32 to vector<4x128xf32>
    %20 = arith.maximumf %1, %19 : vector<4x128xf32>
    %21 = math.absf %1 : vector<4x128xf32>
    %cst_9 = arith.constant 0.000000e+00 : f32
    %22 = vector.broadcast %cst_9 : f32 to vector<4x128xf32>
    %23 = arith.subf %22, %21 : vector<4x128xf32>
    %24 = math.exp %23 : vector<4x128xf32>
    %cst_10 = arith.constant 1.000000e+00 : f32
    %25 = vector.broadcast %cst_10 : f32 to vector<4x128xf32>
    %26 = arith.addf %25, %24 : vector<4x128xf32>
    %27 = math.log %26 : vector<4x128xf32>
    %28 = arith.addf %20, %27 : vector<4x128xf32>
    %29 = vector.shape_cast %28 : vector<4x128xf32> to vector<1x4x128xf32>
    %cst_11 = arith.constant dense<0.000000e+00> : vector<1xf32>
    %30 = vector.multi_reduction <add>, %29, %cst_11 [1, 2] : vector<1x4x128xf32> to vector<1xf32>
    %31 = vector.shape_cast %30 : vector<1xf32> to vector<1x1x1xf32>
    %32 = vector.extract %31[0, 0, 0] : f32 from vector<1x1x1xf32>
    %c1 = arith.constant 1 : index
    %33 = memref.load %arg2[%c1] : memref<2xf32, #tpu.memory_space<smem>>
    memref.store %32, %arg2[%c1] : memref<2xf32, #tpu.memory_space<smem>>
    return
  }
}

</mosaic_0001>

<bundles_post_ra>
// kernel: tpu_custom_call.1
= control target key start
LH: loop header
LB: loop body
LE: loop exit
PB: predicated region body
PF: predicated region fallthrough
CT: control target
= control target key end

     0   :  { %7 = vsyncpa [#allocation3], 0  ;;  %s193_s0 = inlined_call_operand.hbm [shape: f32[4,128], index: 0, kind: input, shape index: {}]   ;;  %s194_s1 = inlined_call_operand.hbm [shape: f32[4,128], index: 1, kind: input, shape index: {}]   ;;  %s195_s2 = inlined_call_operand.hbm [shape: f32[2], index: 2, kind: output, shape index: {}]  }
   0x1   :  { %8 = vsyncpa [#allocation6], 0 }
   0x2   :  { %9 = vsyncpa [#allocation4], 0  ;;  %s166_s9 = smov [#allocation2]   ;;  %s167_s11 = smov [#allocation5]  }
   0x3   :  { %s16_s10 = sshll.u32 %s166_s9, 4  ;;  %s26_s12 = sshll.u32 %s167_s11, 4  ;;  %s17_s10 = int_to_ptr.vmem [resolvable:$true] %s16_s10  ;;  %s27_s12 = int_to_ptr.vmem [resolvable:$true] %s26_s12 }
   0x4   :  { %s120_s13 = scalar_lea.vmem %s17_s10, 64  ;;  %p125_p1 = scmp.lt.s32.totalorder %s17_s10, %s17_s10 }
   0x5   :  { %p121_p0 = scmp.ne.s32.totalorder %s17_s10, %s120_s13  ;;  %p126_p2 = scmp.lt.s32.totalorder %s120_s13, %s120_s13 }
   0x7   :  { %p127_p3 = por %p126_p2, %p125_p1 }
   0x9   :  { %p128_p4 = pnand %p127_p3, %p121_p0 }
   0xb   :  { %131 = shalt.err (!%p128_p4)
}
   0xc   :  { %19 = dma.hbm_to_vmem [thread:$0]  %s193_s0, 64, %s17_s10, [#allocation3]  }
   0xd   :  { %s140_s16 = scalar_lea.vmem %s27_s12, 64  ;;  %p145_p6 = scmp.lt.s32.totalorder %s27_s12, %s27_s12 }
   0xe   :  { %p141_p5 = scmp.ne.s32.totalorder %s27_s12, %s140_s16  ;;  %p146_p7 = scmp.lt.s32.totalorder %s140_s16, %s140_s16 }
  0x10   :  { %p147_p8 = por %p146_p7, %p145_p6 }
  0x12   :  { %p148_p9 = pnand %p147_p8, %p141_p5 }
  0x14   :  { %151 = shalt.err (!%p148_p9)
}
  0x15   :  { %29 = dma.hbm_to_vmem [thread:$0]  %s194_s1, 64, %s27_s12, [#allocation6]  }
  0x16   :  { %160 = dma.done.wait [#allocation3], 64  }
  0x17   :  { %161 = vsyncadd [#allocation3], 4294967232 }
  0x18   :  { %162 = dma.done.wait [#allocation6], 64  }
  0x19   :  { %163 = vsyncadd [#allocation6], 4294967232  ;;  %v36_v0 = vld [vmem:[#allocation2] sm:$0xf]  ;;  %v37_v1 = vld [vmem:[#allocation5] sm:$0xf] }
  0x1a   :  { %v38_v2 = vsub.f32 0.0, %v36_v0  ;;  %v62_v3 = vand.u32 2147483647, %v37_v1  ;;  %v61_v15 = vmax.f32 %v37_v1, 0.0  ;;  %vm48_vm0 = vcmask 1043456   ;;  %s168_s19 = smov [#allocation7]  }
  0x1c   :  { %v40_v4 = vand.u32 2147483647, %v38_v2  ;;  %v63_v5 = vsub.f32 0.0, %v62_v3  ;;  %v39_v14 = vmax.f32 %v38_v2, 0.0 }
  0x1e   :  { %v41_v6 = vsub.f32 0.0, %v40_v4  ;;  %v64_v7 = vmul.f32 1.442695, %v63_v5 }
  0x20   :  { %v42_v8 = vmul.f32 1.442695, %v41_v6  ;;  %104 = vpow2.f32 %v64_v7 }
  0x22   :  { %106 = vpow2.f32 %v42_v8 }
  0x2d   :  { %v105_v9 = vpop.eup %104 }
  0x2e   :  { %v66_v10 = vadd.f32 1.0, %v105_v9 }
  0x2f   :  { %v107_v11 = vpop.eup %106 }
  0x30   :  { %v44_v12 = vadd.f32 1.0, %v107_v11  ;;  %108 = vlog2.f32 %v66_v10 }
  0x32   :  { %110 = vlog2.f32 %v44_v12 }
  0x3d   :  { %v109_v13 = vpop.eup %108 }
  0x3e   :  { %v68_v16 = vmul.f32 0.6931472, %v109_v13 }
  0x3f   :  { %v111_v17 = vpop.eup %110 }
  0x40   :  { %v46_v18 = vmul.f32 0.6931472, %v111_v17  ;;  %v69_v20 = vadd.f32 %v68_v16, %v61_v15 }
  0x42   :  { %v47_v19 = vadd.f32 %v46_v18, %v39_v14  ;;  %v70_v22 = vsel %vm48_vm0, %v69_v20, 0.0 }
  0x44   :  { %v49_v21 = vsel %vm48_vm0, %v47_v19, 0.0 }
  0x45   :  { %50 = vadd.xlane.f32.xlu0 %v49_v21 }
  0x49   :  { %71 = vadd.xlane.f32.xlu0 %v70_v22 }
  0xce   :  { %v51_v23 = vpop.xlane.xlu0 %50 }
  0xcf   :  { %v52_v24 = vrot.slane %v51_v23, 4 }
  0xd1   :  { %v53_v25 = vadd.f32 %v52_v24, %v51_v23 }
  0xd2   :  { %v72_v26 = vpop.xlane.xlu0 %71 }
  0xd3   :  { %v54_v27 = vrot.slane %v53_v25, 2  ;;  %v73_v28 = vrot.slane %v72_v26, 4 }
  0xd5   :  { %v74_v29 = vadd.f32 %v73_v28, %v72_v26  ;;  %v55_v30 = vadd.f32 %v54_v27, %v53_v25 }
  0xd7   :  { %v75_v31 = vrot.slane %v74_v29, 2  ;;  %v56_v32 = vrot.slane %v55_v30, 1 }
  0xd9   :  { %v76_v33 = vadd.f32 %v75_v31, %v74_v29  ;;  %v57_v34 = vadd.f32 %v56_v32, %v55_v30 }
  0xdb   :  { %97 = vpush %v57_v34  ;;  %v77_v35 = vrot.slane %v76_v33, 1 }
  0xdd   :  { %v78_v36 = vadd.f32 %v77_v35, %v76_v33 }
  0xdf   :  { %99 = vpush %v78_v36 }
 0x10c   :  { %s98_s0 = spop %97 }
 0x10d   :  { %60 = sst [smem:[#allocation7]] %s98_s0 }
 0x110   :  { %s100_s1 = spop %99 }
 0x111   :  { %81 = sst [smem:[#allocation7 + $0x1]] %s100_s1 }
 0x112   :  { %89 = dma.smem_to_hbm %s168_s19, 16, %s195_s2, [#allocation4]  }
 0x113   :  { %164 = dma.done.wait [#allocation4], 16  }
 0x114   :  { %165 = vsyncadd [#allocation4], 4294967280 }
 0x115   :  { %93 = sfence }
 0x116   :  { %94 = vsyncpa [#allocation3], 1 }
 0x117   :  { %95 = vsyncpa [#allocation6], 1 }
 0x118   :  { %96 = vsyncpa [#allocation4], 1 }

</bundles_post_ra>
